<compile_context>
chip_gen: v6e
topology: v6e:2x2x1
jax: 0.10.0
libtpu: 0.0.40
codegen_flags: <defaults>
</compile_context>

<pallas_src>
import functools

import numpy as np
import jax
import jax.numpy as jnp
from jax.experimental import pallas as pl
from jax.experimental.pallas import tpu as pltpu


# ----------------------------- configuration -------------------------------
HIDDEN_SIZE = 64
NUM_HEADS = 4
NUM_KV_HEADS = 2
HEAD_DIM = HIDDEN_SIZE // NUM_HEADS            # 16
NUM_KV_GROUPS = NUM_HEADS // NUM_KV_HEADS      # 2 (n_rep of repeat_kv)
INTERMEDIATE_SIZE = 128
RMS_EPS = 1e-6
ATTENTION_MULTIPLIER = 0.5                     # config.attention_multiplier
RESIDUAL_MULTIPLIER = 0.22                     # config.residual_multiplier
INITIALIZER_RANGE = 0.02
ROPE_THETA = 10000.0

BATCH = 2
SEQ = 8
DTYPE = jnp.float32

Q_SIZE = NUM_HEADS * HEAD_DIM                  # 64
KV_SIZE = NUM_KV_HEADS * HEAD_DIM              # 32
QKV_SIZE = Q_SIZE + 2 * KV_SIZE                # 128 (lane-dense fused output)
MASK_NEG = -1e9


# ------------- rotate_half as block-diagonal matmul (hoisted) ----------------
def _rotate_half_matrix_np(n_heads, head_dim):
    """P such that x @ P == rotate_half(x), applied independently per head."""
    half = head_dim // 2
    p = np.zeros((head_dim, head_dim), np.float32)
    p[:half, half:] = np.eye(half, dtype=np.float32)    # out[half:] =  x[:half]
    p[half:, :half] = -np.eye(half, dtype=np.float32)   # out[:half] = -x[half:]
    return np.kron(np.eye(n_heads, dtype=np.float32), p)


_ROT_Q = jnp.asarray(_rotate_half_matrix_np(NUM_HEADS, HEAD_DIM), DTYPE)
_ROT_K = jnp.asarray(_rotate_half_matrix_np(NUM_KV_HEADS, HEAD_DIM), DTYPE)


# ------------------------------- fused kernel --------------------------------
def _decoder_layer_kernel(
    x_ref,        # (BS, H)       hidden states, batch folded into sublanes
    cosq_ref,     # (BS, Q_SIZE)  rotary cos replicated over q heads
    sinq_ref,     # (BS, Q_SIZE)
    cosk_ref,     # (BS, KV_SIZE) rotary cos replicated over kv heads
    sink_ref,     # (BS, KV_SIZE)
    mask_ref,     # (BS, BS)      block-diagonal additive attention mask
    wqkv_ref,     # (H, QKV_SIZE) fused [Wq*attn_mult | Wk | Wv] (in, out)
    wo_ref,       # (Q_SIZE, H)   Wo * residual_multiplier
    wgu_ref,      # (H, 2*I)      fused [W_gate | W_up]
    wdn_ref,      # (I, H)        W_down * residual_multiplier
    ln1_ref,      # (1, H)
    ln2_ref,      # (1, H)
    rotq_ref,     # (Q_SIZE, Q_SIZE)   block-diag rotate_half matrix for q
    rotk_ref,     # (KV_SIZE, KV_SIZE) block-diag rotate_half matrix for k
    o_ref,        # (BS, H)
    *, eps,
):
    f32 = jnp.float32
    D = HEAD_DIM
    BS = x_ref.shape[0]

    def rmsnorm(v, w):
        var = jnp.mean(v * v, axis=-1, keepdims=True)
        return v * jax.lax.rsqrt(var + eps) * w

    x = x_ref[...].astype(f32)                                    # (BS, H)

    # ---- input layernorm + fused QKV projection (attn_mult folded in Wq) ----
    normed = rmsnorm(x, ln1_ref[...].astype(f32))
    qkv = jnp.dot(normed, wqkv_ref[...].astype(f32),
                  preferred_element_type=f32)                     # (BS, 128)
    q = qkv[:, :Q_SIZE]                                           # (BS, 64)
    k = qkv[:, Q_SIZE:Q_SIZE + KV_SIZE]                           # (BS, 32)
    v = qkv[:, Q_SIZE + KV_SIZE:]                                 # (BS, 32)

    # ---- RoPE: rotate_half via block-diag matmul (MXU), tables lane-ready ----
    q = (q * cosq_ref[...].astype(f32)
         + jnp.dot(q, rotq_ref[...].astype(f32),
                   preferred_element_type=f32) * sinq_ref[...].astype(f32))
    k = (k * cosk_ref[...].astype(f32)
         + jnp.dot(k, rotk_ref[...].astype(f32),
                   preferred_element_type=f32) * sink_ref[...].astype(f32))

    # ---- GQA attention: per KV group, q-heads stacked along sublanes --------
    mask = mask_ref[...].astype(f32)                              # (BS, BS)
    mask_g = jnp.concatenate([mask] * NUM_KV_GROUPS, axis=0)      # (G*BS, BS)
    wo = wo_ref[...].astype(f32)                                  # (64, H)

    attn = jnp.zeros_like(x)                                      # (BS, H)
    for g in range(NUM_KV_HEADS):
        heads = [g * NUM_KV_GROUPS + r for r in range(NUM_KV_GROUPS)]
        k_g = k[:, g * D:(g + 1) * D]                             # (BS, D)
        v_g = v[:, g * D:(g + 1) * D]                             # (BS, D)
        q_g = jnp.concatenate([q[:, h * D:(h + 1) * D] for h in heads],
                              axis=0)                             # (G*BS, D)
        s = jax.lax.dot_general(q_g, k_g, (((1,), (1,)), ((), ())),
                                preferred_element_type=f32)       # (G*BS, BS)
        s = s + mask_g
        s = s - jnp.max(s, axis=-1, keepdims=True)
        p = jnp.exp(s)
        p = p / jnp.sum(p, axis=-1, keepdims=True)                # exact softmax
        ctx = jnp.dot(p, v_g, preferred_element_type=f32)         # (G*BS, D)
        # fused o_proj (residual_multiplier pre-folded): no lane concat of heads
        for r, h in enumerate(heads):
            attn = attn + jnp.dot(ctx[r * BS:(r + 1) * BS],
                                  wo[h * D:(h + 1) * D, :],
                                  preferred_element_type=f32)     # (BS, H)

    hidden = x + attn                                             # residual

    # ---- MLP block (fused gate_up, SiLU*up, down with res_mult folded) ------
    normed2 = rmsnorm(hidden, ln2_ref[...].astype(f32))
    gate_up = jnp.dot(normed2, wgu_ref[...].astype(f32),
                      preferred_element_type=f32)                 # (BS, 2*I)
    gate = gate_up[:, :INTERMEDIATE_SIZE]
    up = gate_up[:, INTERMEDIATE_SIZE:]
    inter = gate * jax.nn.sigmoid(gate) * up                      # SiLU(g) * up
    mlp = jnp.dot(inter, wdn_ref[...].astype(f32),
                  preferred_element_type=f32)                     # (BS, H)

    o_ref[...] = (hidden + mlp).astype(o_ref.dtype)


# ------------------------------ wrapper --------------------------------------
def _granite_decoder_layer(hidden_states, attention_mask, position_embeddings,
                           params):
    """hidden_states: (B, S, H); attention_mask: (B, 1, S, S) additive;
    position_embeddings: (cos, sin) each (B, S, head_dim); params: prepared."""
    b, s, h = hidden_states.shape
    bs = b * s
    cos, sin = position_embeddings
    d = cos.shape[-1]

    # Fold batch into sublanes; pre-replicate RoPE tables along head lanes.
    x2 = hidden_states.reshape(bs, h)
    cos2 = cos.reshape(bs, d).astype(DTYPE)
    sin2 = sin.reshape(bs, d).astype(DTYPE)
    cos_q = jnp.tile(cos2, (1, NUM_HEADS))
    sin_q = jnp.tile(sin2, (1, NUM_HEADS))
    cos_k = jnp.tile(cos2, (1, NUM_KV_HEADS))
    sin_k = jnp.tile(sin2, (1, NUM_KV_HEADS))

    # Block-diagonal additive mask over the folded token axis: within-batch
    # entries come from attention_mask, cross-batch entries are masked out.
    m = attention_mask[:, 0].astype(DTYPE)                 # (B, S, S)
    tok_b = jnp.arange(bs) // s
    tok_s = jnp.arange(bs) % s
    big_mask = m[tok_b[:, None], tok_s[:, None], tok_s[None, :]]
    big_mask = jnp.where(tok_b[:, None] == tok_b[None, :], big_mask,
                         jnp.asarray(MASK_NEG, DTYPE))     # (BS, BS)

    ln1 = params["ln1_w"].reshape(1, h).astype(DTYPE)
    ln2 = params["ln2_w"].reshape(1, h).astype(DTYPE)

    vmem = pl.BlockSpec(memory_space=pltpu.MemorySpace.VMEM)
    out2 = pl.pallas_call(
        functools.partial(_decoder_layer_kernel, eps=RMS_EPS),
        out_shape=jax.ShapeDtypeStruct((bs, h), hidden_states.dtype),
        in_specs=[vmem] * 14,
        out_specs=vmem,
    )(x2, cos_q, sin_q, cos_k, sin_k, big_mask,
      params["wqkv"], params["wo"], params["w_gate_up"], params["w_down"],
      ln1, ln2, _ROT_Q, _ROT_K)

    return out2.reshape(b, s, h)


granite_decoder_layer = jax.jit(_granite_decoder_layer)


# ----------------------------- param / input setup ---------------------------
def init_params(key):
    """Random weights matching the torch module init (stored as (in, out))."""
    std = INITIALIZER_RANGE
    ks = jax.random.split(key, 7)
    return {
        "wq": jax.random.normal(ks[0], (HIDDEN_SIZE, Q_SIZE), DTYPE) * std,
        "wk": jax.random.normal(ks[1], (HIDDEN_SIZE, KV_SIZE), DTYPE) * std,
        "wv": jax.random.normal(ks[2], (HIDDEN_SIZE, KV_SIZE), DTYPE) * std,
        "wo": jax.random.normal(ks[3], (Q_SIZE, HIDDEN_SIZE), DTYPE) * std,
        "w_gate": jax.random.normal(ks[4], (HIDDEN_SIZE, INTERMEDIATE_SIZE), DTYPE) * std,
        "w_up": jax.random.normal(ks[5], (HIDDEN_SIZE, INTERMEDIATE_SIZE), DTYPE) * std,
        "w_down": jax.random.normal(ks[6], (INTERMEDIATE_SIZE, HIDDEN_SIZE), DTYPE) * std,
        "ln1_w": jnp.ones((HIDDEN_SIZE,), DTYPE),
        "ln2_w": jnp.ones((HIDDEN_SIZE,), DTYPE),
    }


def prepare_params(p):
    """One-time host-side weight fusion + scalar-multiplier folding.

    attention_multiplier is folded into the Wq columns (scaling q scales the
    scores identically; RoPE is linear), residual_multiplier into Wo / W_down.
    """
    wqkv = jnp.concatenate(
        [p["wq"] * ATTENTION_MULTIPLIER, p["wk"], p["wv"]], axis=1)  # (H, 128)
    return {
        "wqkv": wqkv,
        "wo": p["wo"] * RESIDUAL_MULTIPLIER,                         # (64, H)
        "w_gate_up": jnp.concatenate([p["w_gate"], p["w_up"]], axis=1),  # (H, 256)
        "w_down": p["w_down"] * RESIDUAL_MULTIPLIER,                 # (I, H)
        "ln1_w": p["ln1_w"],
        "ln2_w": p["ln2_w"],
    }


def make_rope(batch, seq, head_dim, theta=ROPE_THETA):
    inv_freq = 1.0 / (theta ** (jnp.arange(0, head_dim, 2, dtype=jnp.float32) / head_dim))
    pos = jnp.arange(seq, dtype=jnp.float32)
    freqs = pos[:, None] * inv_freq[None, :]            # (S, D/2)
    emb = jnp.concatenate([freqs, freqs], axis=-1)      # (S, D)
    cos = jnp.broadcast_to(jnp.cos(emb), (batch, seq, head_dim)).astype(DTYPE)
    sin = jnp.broadcast_to(jnp.sin(emb), (batch, seq, head_dim)).astype(DTYPE)
    return cos, sin


def make_causal_mask(batch, seq):
    i = jnp.arange(seq)[:, None]
    j = jnp.arange(seq)[None, :]
    mask = jnp.where(j <= i, 0.0, MASK_NEG).astype(DTYPE)   # additive causal mask
    return jnp.broadcast_to(mask, (batch, 1, seq, seq))


# ----------------------------------- main -------------------------------------
if __name__ == "__main__":
    key = jax.random.PRNGKey(0)
    k_in, k_par = jax.random.split(key)

    hidden_states = jax.random.normal(k_in, (BATCH, SEQ, HIDDEN_SIZE), DTYPE)
    params = prepare_params(init_params(k_par))     # one-time host-side prep
    cos, sin = make_rope(BATCH, SEQ, HEAD_DIM)
    attention_mask = make_causal_mask(BATCH, SEQ)

    out = granite_decoder_layer(hidden_states, attention_mask, (cos, sin), params)
    out = jax.block_until_ready(out)
    assert out.shape == (BATCH, SEQ, HIDDEN_SIZE)
    assert bool(jnp.all(jnp.isfinite(out)))
    print("KERNEL_OK")
</pallas_src>

<mosaic_0001>
module attributes {stable_mosaic.version = 11 : i64} {
  func.func @_decoder_layer_kernel(%arg0: memref<16x64xf32, #tpu.memory_space<vmem>>, %arg1: memref<16x64xf32, #tpu.memory_space<vmem>>, %arg2: memref<16x64xf32, #tpu.memory_space<vmem>>, %arg3: memref<16x32xf32, #tpu.memory_space<vmem>>, %arg4: memref<16x32xf32, #tpu.memory_space<vmem>>, %arg5: memref<16x16xf32, #tpu.memory_space<vmem>>, %arg6: memref<64x128xf32, #tpu.memory_space<vmem>>, %arg7: memref<64x64xf32, #tpu.memory_space<vmem>>, %arg8: memref<64x256xf32, #tpu.memory_space<vmem>>, %arg9: memref<128x64xf32, #tpu.memory_space<vmem>>, %arg10: memref<1x64xf32, #tpu.memory_space<vmem>>, %arg11: memref<1x64xf32, #tpu.memory_space<vmem>>, %arg12: memref<64x64xf32, #tpu.memory_space<vmem>>, %arg13: memref<32x32xf32, #tpu.memory_space<vmem>>, %arg14: memref<16x64xf32, #tpu.memory_space<vmem>>) attributes {dimension_semantics = [], scalar_prefetch = 0 : i64, scratch_operands = 0 : i64, tpu.core_type = #tpu.core_type<tc>} {
    %c0 = arith.constant 0 : index
    %c0_0 = arith.constant 0 : index
    %0 = vector.load %arg0[%c0, %c0_0] : memref<16x64xf32, #tpu.memory_space<vmem>>, vector<16x64xf32>
    %c0_1 = arith.constant 0 : index
    %c0_2 = arith.constant 0 : index
    %1 = vector.load %arg10[%c0_1, %c0_2] : memref<1x64xf32, #tpu.memory_space<vmem>>, vector<1x64xf32>
    %2 = arith.mulf %0, %0 : vector<16x64xf32>
    %cst = arith.constant dense<0.000000e+00> : vector<16xf32>
    %3 = vector.multi_reduction <add>, %2, %cst [1] : vector<16x64xf32> to vector<16xf32>
    %4 = vector.shape_cast %3 : vector<16xf32> to vector<16x1xf32>
    %cst_3 = arith.constant 6.400000e+01 : f32
    %5 = vector.broadcast %cst_3 : f32 to vector<16x1xf32>
    %6 = arith.divf %4, %5 : vector<16x1xf32>
    %cst_4 = arith.constant 9.99999997E-7 : f32
    %7 = vector.broadcast %cst_4 : f32 to vector<16x1xf32>
    %8 = arith.addf %6, %7 : vector<16x1xf32>
    %9 = math.rsqrt %8 : vector<16x1xf32>
    %10 = vector.broadcast %9 : vector<16x1xf32> to vector<16x64xf32>
    %11 = arith.mulf %0, %10 : vector<16x64xf32>
    %12 = vector.broadcast %1 : vector<1x64xf32> to vector<16x64xf32>
    %13 = arith.mulf %11, %12 : vector<16x64xf32>
    %c0_5 = arith.constant 0 : index
    %c0_6 = arith.constant 0 : index
    %14 = vector.load %arg6[%c0_5, %c0_6] : memref<64x128xf32, #tpu.memory_space<vmem>>, vector<64x128xf32>
    %cst_7 = arith.constant dense<0.000000e+00> : vector<16x128xf32>
    %15 = tpu.matmul %13, %14, %cst_7 {dimension_numbers = #tpu.dot_dimension_numbers<[1], [0], [0], [1], [0, 0, 1, 1], [], []>} : vector<16x64xf32>, vector<64x128xf32>, vector<16x128xf32> -> vector<16x128xf32>
    %16 = vector.extract_strided_slice %15 {offsets = [0, 0], sizes = [16, 64], strides = [1, 1]} : vector<16x128xf32> to vector<16x64xf32>
    %17 = vector.extract_strided_slice %15 {offsets = [0, 64], sizes = [16, 32], strides = [1, 1]} : vector<16x128xf32> to vector<16x32xf32>
    %18 = vector.extract_strided_slice %15 {offsets = [0, 96], sizes = [16, 32], strides = [1, 1]} : vector<16x128xf32> to vector<16x32xf32>
    %c0_8 = arith.constant 0 : index
    %c0_9 = arith.constant 0 : index
    %19 = vector.load %arg1[%c0_8, %c0_9] : memref<16x64xf32, #tpu.memory_space<vmem>>, vector<16x64xf32>
    %20 = arith.mulf %16, %19 : vector<16x64xf32>
    %c0_10 = arith.constant 0 : index
    %c0_11 = arith.constant 0 : index
    %21 = vector.load %arg12[%c0_10, %c0_11] : memref<64x64xf32, #tpu.memory_space<vmem>>, vector<64x64xf32>
    %cst_12 = arith.constant dense<0.000000e+00> : vector<16x64xf32>
    %22 = tpu.matmul %16, %21, %cst_12 {dimension_numbers = #tpu.dot_dimension_numbers<[1], [0], [0], [1], [0, 0, 1, 1], [], []>} : vector<16x64xf32>, vector<64x64xf32>, vector<16x64xf32> -> vector<16x64xf32>
    %c0_13 = arith.constant 0 : index
    %c0_14 = arith.constant 0 : index
    %23 = vector.load %arg2[%c0_13, %c0_14] : memref<16x64xf32, #tpu.memory_space<vmem>>, vector<16x64xf32>
    %24 = arith.mulf %22, %23 : vector<16x64xf32>
    %25 = arith.addf %20, %24 : vector<16x64xf32>
    %c0_15 = arith.constant 0 : index
    %c0_16 = arith.constant 0 : index
    %26 = vector.load %arg3[%c0_15, %c0_16] : memref<16x32xf32, #tpu.memory_space<vmem>>, vector<16x32xf32>
    %27 = arith.mulf %17, %26 : vector<16x32xf32>
    %c0_17 = arith.constant 0 : index
    %c0_18 = arith.constant 0 : index
    %28 = vector.load %arg13[%c0_17, %c0_18] : memref<32x32xf32, #tpu.memory_space<vmem>>, vector<32x32xf32>
    %cst_19 = arith.constant dense<0.000000e+00> : vector<16x32xf32>
    %29 = tpu.matmul %17, %28, %cst_19 {dimension_numbers = #tpu.dot_dimension_numbers<[1], [0], [0], [1], [0, 0, 1, 1], [], []>} : vector<16x32xf32>, vector<32x32xf32>, vector<16x32xf32> -> vector<16x32xf32>
    %c0_20 = arith.constant 0 : index
    %c0_21 = arith.constant 0 : index
    %30 = vector.load %arg4[%c0_20, %c0_21] : memref<16x32xf32, #tpu.memory_space<vmem>>, vector<16x32xf32>
    %31 = arith.mulf %29, %30 : vector<16x32xf32>
    %32 = arith.addf %27, %31 : vector<16x32xf32>
    %c0_22 = arith.constant 0 : index
    %c0_23 = arith.constant 0 : index
    %33 = vector.load %arg5[%c0_22, %c0_23] : memref<16x16xf32, #tpu.memory_space<vmem>>, vector<16x16xf32>
    %34 = tpu.concatenate %33, %33 in 0 : vector<16x16xf32>, vector<16x16xf32> -> vector<32x16xf32>
    %c0_24 = arith.constant 0 : index
    %c0_25 = arith.constant 0 : index
    %35 = vector.load %arg7[%c0_24, %c0_25] : memref<64x64xf32, #tpu.memory_space<vmem>>, vector<64x64xf32>
    %cst_26 = arith.constant 0.000000e+00 : f32
    %36 = vector.broadcast %cst_26 : f32 to vector<16x64xf32>
    %37 = vector.extract_strided_slice %32 {offsets = [0, 0], sizes = [16, 16], strides = [1, 1]} : vector<16x32xf32> to vector<16x16xf32>
    %38 = vector.extract_strided_slice %18 {offsets = [0, 0], sizes = [16, 16], strides = [1, 1]} : vector<16x32xf32> to vector<16x16xf32>
    %39 = vector.extract_strided_slice %25 {offsets = [0, 0], sizes = [16, 16], strides = [1, 1]} : vector<16x64xf32> to vector<16x16xf32>
    %40 = vector.extract_strided_slice %25 {offsets = [0, 16], sizes = [16, 16], strides = [1, 1]} : vector<16x64xf32> to vector<16x16xf32>
    %41 = tpu.concatenate %39, %40 in 0 : vector<16x16xf32>, vector<16x16xf32> -> vector<32x16xf32>
    %cst_27 = arith.constant dense<0.000000e+00> : vector<32x16xf32>
    %42 = tpu.matmul %41, %37, %cst_27 {dimension_numbers = #tpu.dot_dimension_numbers<[1], [1], [0], [0], [0, 0, 1, 0], [], []>} : vector<32x16xf32>, vector<16x16xf32>, vector<32x16xf32> -> vector<32x16xf32>
    %43 = arith.addf %42, %34 : vector<32x16xf32>
    %cst_28 = arith.constant dense<0xFF800000> : vector<32xf32>
    %44 = vector.multi_reduction <maximumf>, %43, %cst_28 [1] : vector<32x16xf32> to vector<32xf32>
    %45 = vector.shape_cast %44 : vector<32xf32> to vector<32x1xf32>
    %46 = vector.broadcast %45 : vector<32x1xf32> to vector<32x16xf32>
    %47 = arith.subf %43, %46 : vector<32x16xf32>
    %48 = math.exp %47 : vector<32x16xf32>
    %cst_29 = arith.constant dense<0.000000e+00> : vector<32xf32>
    %49 = vector.multi_reduction <add>, %48, %cst_29 [1] : vector<32x16xf32> to vector<32xf32>
    %50 = vector.shape_cast %49 : vector<32xf32> to vector<32x1xf32>
    %51 = vector.broadcast %50 : vector<32x1xf32> to vector<32x16xf32>
    %52 = arith.divf %48, %51 : vector<32x16xf32>
    %cst_30 = arith.constant dense<0.000000e+00> : vector<32x16xf32>
    %53 = tpu.matmul %52, %38, %cst_30 {dimension_numbers = #tpu.dot_dimension_numbers<[1], [0], [0], [1], [0, 0, 1, 1], [], []>} : vector<32x16xf32>, vector<16x16xf32>, vector<32x16xf32> -> vector<32x16xf32>
    %54 = vector.extract_strided_slice %53 {offsets = [0, 0], sizes = [16, 16], strides = [1, 1]} : vector<32x16xf32> to vector<16x16xf32>
    %55 = vector.extract_strided_slice %35 {offsets = [0, 0], sizes = [16, 64], strides = [1, 1]} : vector<64x64xf32> to vector<16x64xf32>
    %cst_31 = arith.constant dense<0.000000e+00> : vector<16x64xf32>
    %56 = tpu.matmul %54, %55, %cst_31 {dimension_numbers = #tpu.dot_dimension_numbers<[1], [0], [0], [1], [0, 0, 1, 1], [], []>} : vector<16x16xf32>, vector<16x64xf32>, vector<16x64xf32> -> vector<16x64xf32>
    %57 = arith.addf %36, %56 : vector<16x64xf32>
    %58 = vector.extract_strided_slice %53 {offsets = [16, 0], sizes = [16, 16], strides = [1, 1]} : vector<32x16xf32> to vector<16x16xf32>
    %59 = vector.extract_strided_slice %35 {offsets = [16, 0], sizes = [16, 64], strides = [1, 1]} : vector<64x64xf32> to vector<16x64xf32>
    %cst_32 = arith.constant dense<0.000000e+00> : vector<16x64xf32>
    %60 = tpu.matmul %58, %59, %cst_32 {dimension_numbers = #tpu.dot_dimension_numbers<[1], [0], [0], [1], [0, 0, 1, 1], [], []>} : vector<16x16xf32>, vector<16x64xf32>, vector<16x64xf32> -> vector<16x64xf32>
    %61 = arith.addf %57, %60 : vector<16x64xf32>
    %62 = vector.extract_strided_slice %32 {offsets = [0, 16], sizes = [16, 16], strides = [1, 1]} : vector<16x32xf32> to vector<16x16xf32>
    %63 = vector.extract_strided_slice %18 {offsets = [0, 16], sizes = [16, 16], strides = [1, 1]} : vector<16x32xf32> to vector<16x16xf32>
    %64 = vector.extract_strided_slice %25 {offsets = [0, 32], sizes = [16, 16], strides = [1, 1]} : vector<16x64xf32> to vector<16x16xf32>
    %65 = vector.extract_strided_slice %25 {offsets = [0, 48], sizes = [16, 16], strides = [1, 1]} : vector<16x64xf32> to vector<16x16xf32>
    %66 = tpu.concatenate %64, %65 in 0 : vector<16x16xf32>, vector<16x16xf32> -> vector<32x16xf32>
    %cst_33 = arith.constant dense<0.000000e+00> : vector<32x16xf32>
    %67 = tpu.matmul %66, %62, %cst_33 {dimension_numbers = #tpu.dot_dimension_numbers<[1], [1], [0], [0], [0, 0, 1, 0], [], []>} : vector<32x16xf32>, vector<16x16xf32>, vector<32x16xf32> -> vector<32x16xf32>
    %68 = arith.addf %67, %34 : vector<32x16xf32>
    %cst_34 = arith.constant dense<0xFF800000> : vector<32xf32>
    %69 = vector.multi_reduction <maximumf>, %68, %cst_34 [1] : vector<32x16xf32> to vector<32xf32>
    %70 = vector.shape_cast %69 : vector<32xf32> to vector<32x1xf32>
    %71 = vector.broadcast %70 : vector<32x1xf32> to vector<32x16xf32>
    %72 = arith.subf %68, %71 : vector<32x16xf32>
    %73 = math.exp %72 : vector<32x16xf32>
    %cst_35 = arith.constant dense<0.000000e+00> : vector<32xf32>
    %74 = vector.multi_reduction <add>, %73, %cst_35 [1] : vector<32x16xf32> to vector<32xf32>
    %75 = vector.shape_cast %74 : vector<32xf32> to vector<32x1xf32>
    %76 = vector.broadcast %75 : vector<32x1xf32> to vector<32x16xf32>
    %77 = arith.divf %73, %76 : vector<32x16xf32>
    %cst_36 = arith.constant dense<0.000000e+00> : vector<32x16xf32>
    %78 = tpu.matmul %77, %63, %cst_36 {dimension_numbers = #tpu.dot_dimension_numbers<[1], [0], [0], [1], [0, 0, 1, 1], [], []>} : vector<32x16xf32>, vector<16x16xf32>, vector<32x16xf32> -> vector<32x16xf32>
    %79 = vector.extract_strided_slice %78 {offsets = [0, 0], sizes = [16, 16], strides = [1, 1]} : vector<32x16xf32> to vector<16x16xf32>
    %80 = vector.extract_strided_slice %35 {offsets = [32, 0], sizes = [16, 64], strides = [1, 1]} : vector<64x64xf32> to vector<16x64xf32>
    %cst_37 = arith.constant dense<0.000000e+00> : vector<16x64xf32>
    %81 = tpu.matmul %79, %80, %cst_37 {dimension_numbers = #tpu.dot_dimension_numbers<[1], [0], [0], [1], [0, 0, 1, 1], [], []>} : vector<16x16xf32>, vector<16x64xf32>, vector<16x64xf32> -> vector<16x64xf32>
    %82 = arith.addf %61, %81 : vector<16x64xf32>
    %83 = vector.extract_strided_slice %78 {offsets = [16, 0], sizes = [16, 16], strides = [1, 1]} : vector<32x16xf32> to vector<16x16xf32>
    %84 = vector.extract_strided_slice %35 {offsets = [48, 0], sizes = [16, 64], strides = [1, 1]} : vector<64x64xf32> to vector<16x64xf32>
    %cst_38 = arith.constant dense<0.000000e+00> : vector<16x64xf32>
    %85 = tpu.matmul %83, %84, %cst_38 {dimension_numbers = #tpu.dot_dimension_numbers<[1], [0], [0], [1], [0, 0, 1, 1], [], []>} : vector<16x16xf32>, vector<16x64xf32>, vector<16x64xf32> -> vector<16x64xf32>
    %86 = arith.addf %82, %85 : vector<16x64xf32>
    %87 = arith.addf %0, %86 : vector<16x64xf32>
    %c0_39 = arith.constant 0 : index
    %c0_40 = arith.constant 0 : index
    %88 = vector.load %arg11[%c0_39, %c0_40] : memref<1x64xf32, #tpu.memory_space<vmem>>, vector<1x64xf32>
    %89 = arith.mulf %87, %87 : vector<16x64xf32>
    %cst_41 = arith.constant dense<0.000000e+00> : vector<16xf32>
    %90 = vector.multi_reduction <add>, %89, %cst_41 [1] : vector<16x64xf32> to vector<16xf32>
    %91 = vector.shape_cast %90 : vector<16xf32> to vector<16x1xf32>
    %cst_42 = arith.constant 6.400000e+01 : f32
    %92 = vector.broadcast %cst_42 : f32 to vector<16x1xf32>
    %93 = arith.divf %91, %92 : vector<16x1xf32>
    %cst_43 = arith.constant 9.99999997E-7 : f32
    %94 = vector.broadcast %cst_43 : f32 to vector<16x1xf32>
    %95 = arith.addf %93, %94 : vector<16x1xf32>
    %96 = math.rsqrt %95 : vector<16x1xf32>
    %97 = vector.broadcast %96 : vector<16x1xf32> to vector<16x64xf32>
    %98 = arith.mulf %87, %97 : vector<16x64xf32>
    %99 = vector.broadcast %88 : vector<1x64xf32> to vector<16x64xf32>
    %100 = arith.mulf %98, %99 : vector<16x64xf32>
    %c0_44 = arith.constant 0 : index
    %c0_45 = arith.constant 0 : index
    %101 = vector.load %arg8[%c0_44, %c0_45] : memref<64x256xf32, #tpu.memory_space<vmem>>, vector<64x256xf32>
    %cst_46 = arith.constant dense<0.000000e+00> : vector<16x256xf32>
    %102 = tpu.matmul %100, %101, %cst_46 {dimension_numbers = #tpu.dot_dimension_numbers<[1], [0], [0], [1], [0, 0, 1, 1], [], []>} : vector<16x64xf32>, vector<64x256xf32>, vector<16x256xf32> -> vector<16x256xf32>
    %103 = vector.extract_strided_slice %102 {offsets = [0, 0], sizes = [16, 128], strides = [1, 1]} : vector<16x256xf32> to vector<16x128xf32>
    %104 = vector.extract_strided_slice %102 {offsets = [0, 128], sizes = [16, 128], strides = [1, 1]} : vector<16x256xf32> to vector<16x128xf32>
    %105 = arith.negf %103 : vector<16x128xf32>
    %106 = math.exp %105 : vector<16x128xf32>
    %cst_47 = arith.constant 1.000000e+00 : f32
    %107 = vector.broadcast %cst_47 : f32 to vector<16x128xf32>
    %108 = arith.addf %107, %106 : vector<16x128xf32>
    %109 = arith.divf %107, %108 : vector<16x128xf32>
    %110 = arith.mulf %103, %109 : vector<16x128xf32>
    %111 = arith.mulf %110, %104 : vector<16x128xf32>
    %c0_48 = arith.constant 0 : index
    %c0_49 = arith.constant 0 : index
    %112 = vector.load %arg9[%c0_48, %c0_49] : memref<128x64xf32, #tpu.memory_space<vmem>>, vector<128x64xf32>
    %cst_50 = arith.constant dense<0.000000e+00> : vector<16x64xf32>
    %113 = tpu.matmul %111, %112, %cst_50 {dimension_numbers = #tpu.dot_dimension_numbers<[1], [0], [0], [1], [0, 0, 1, 1], [], []>} : vector<16x128xf32>, vector<128x64xf32>, vector<16x64xf32> -> vector<16x64xf32>
    %114 = arith.addf %87, %113 : vector<16x64xf32>
    %c0_51 = arith.constant 0 : index
    %c0_52 = arith.constant 0 : index
    %115 = vector.load %arg14[%c0_51, %c0_52] : memref<16x64xf32, #tpu.memory_space<vmem>>, vector<16x64xf32>
    tpu.vector_store %arg14[%c0_51, %c0_52], %114 {strides = array<i32>} : memref<16x64xf32, #tpu.memory_space<vmem>>, vector<16x64xf32>,
    return
  }
}

</mosaic_0001>

<bundles_post_ra>
// kernel: tile.27
= control target key start
LH: loop header
LB: loop body
LE: loop exit
PB: predicated region body
PF: predicated region fallthrough
CT: control target
= control target key end

     0   :  { %vm83_vm0 = vcmask 1047556   ;;  %vm85_vm1 = vcmask 130048   ;;  %vm104_vm2 = vcmask 261248   ;;  %s226_s0 = inlined_call_operand.vmem [shape: f32[16,2,16], index: 0, kind: input, shape index: {}]   ;;  %s227_s1 = inlined_call_operand.vmem [shape: f32[16,32], index: 1, kind: output, shape index: {}]  }
   0x1   :  { %v139_v0 = vld [vmem:[%s226_s0 + $0xe] sm:$0x3]  ;;  %v140_v1 = vld [vmem:[%s226_s0 + $0xc] sm:$0x3]  ;;  %v141_v2 = vld [vmem:[%s226_s0 + $0xa] sm:$0x3] }
   0x2   :  { %49 = vst [vmem:[#allocation0 + $0x38] sm:$0x3] %v139_v0  ;;  %54 = vst [vmem:[#allocation0 + $0x30] sm:$0x3] %v140_v1  ;;  %v142_v3 = vld [vmem:[%s226_s0 + $0x8] sm:$0x3] }
   0x3   :  { %59 = vst [vmem:[#allocation0 + $0x28] sm:$0x3] %v141_v2  ;;  %v143_v4 = vld [vmem:[%s226_s0 + $0x6] sm:$0x3]  ;;  %v144_v5 = vld [vmem:[%s226_s0 + $0x4] sm:$0x3] }
   0x4   :  { %64 = vst [vmem:[#allocation0 + $0x20] sm:$0x3] %v142_v3  ;;  %69 = vst [vmem:[#allocation0 + $0x18] sm:$0x3] %v143_v4  ;;  %v145_v6 = vld [vmem:[%s226_s0 + $0x2] sm:$0x3] }
   0x5   :  { %74 = vst [vmem:[#allocation0 + $0x10] sm:$0x3] %v144_v5  ;;  %v79_v7 = vld [vmem:[%s226_s0] sm:$0x3]  ;;  %78 = vst [vmem:[#allocation0 + $0x8] sm:$0x3] %v145_v6 }
   0x6   :  { %80 = vst [vmem:[#allocation0] sm:$0x3] %v79_v7  ;;  %v131_v8 = vld [vmem:[%s226_s0 + $0x1e] sm:$0x3]  ;;  %v132_v9 = vld [vmem:[%s226_s0 + $0x1c] sm:$0x3] }
   0x7   :  { %v133_v10 = vld [vmem:[%s226_s0 + $0x1a] sm:$0x3]  ;;  %9 = vst [vmem:[#allocation0 + $0x78] sm:$0x3] %v131_v8  ;;  %14 = vst [vmem:[#allocation0 + $0x70] sm:$0x3] %v132_v9 }
   0x8   :  { %19 = vst [vmem:[#allocation0 + $0x68] sm:$0x3] %v133_v10  ;;  %v134_v11 = vld [vmem:[%s226_s0 + $0x18] sm:$0x3]  ;;  %v135_v12 = vld [vmem:[%s226_s0 + $0x16] sm:$0x3] }
   0x9   :  { %v136_v13 = vld [vmem:[%s226_s0 + $0x14] sm:$0x3]  ;;  %24 = vst [vmem:[#allocation0 + $0x60] sm:$0x3] %v134_v11  ;;  %29 = vst [vmem:[#allocation0 + $0x58] sm:$0x3] %v135_v12 }
   0xa   :  { %34 = vst [vmem:[#allocation0 + $0x50] sm:$0x3] %v136_v13  ;;  %v137_v14 = vld [vmem:[%s226_s0 + $0x12] sm:$0x3]  ;;  %v138_v15 = vld [vmem:[%s226_s0 + $0x10] sm:$0x3] }
   0xb   :  { %39 = vst [vmem:[#allocation0 + $0x48] sm:$0x3] %v137_v14  ;;  %44 = vst [vmem:[#allocation0 + $0x40] sm:$0x3] %v138_v15  ;;  %s149_s0 = smov 16  }
   0xc   :  { %v99_v16 = vld [vmem:[#allocation0 + $0x1] ss:$8 sm:$0xf0]   ;;  %v82_v17 = vld [vmem:[#allocation0] ss:$8 sm:$0xf0]  }
   0xd   :  { %v97_v18 = vld [vmem:[#allocation0 + $0x1] ss:$8 sm:$0xf]   ;;  %v81_v19 = vld [vmem:[#allocation0] ss:$8 sm:$0xf]  }
   0xe   :  { %v101_v20 = vsel %vm83_vm0, %v99_v16, %v97_v18  ;;  %v84_v21 = vsel %vm83_vm0, %v82_v17, %v81_v19 }
   0xf   :  { %102 = vrot.lane.b32.xlu0 %v101_v20, %s149_s0  ;;  %86 = vst.msk [vmem:[%s227_s1] sm:$0xff] %vm85_vm1, %v84_v21  }
  0x10   :  { %v109_v22 = vld [vmem:[#allocation0 + $0x41] ss:$8 sm:$0xf0]   ;;  %v90_v23 = vld [vmem:[#allocation0 + $0x40] ss:$8 sm:$0xf0]  }
  0x12   :  { %v107_v24 = vld [vmem:[#allocation0 + $0x41] ss:$8 sm:$0xf]   ;;  %v88_v25 = vld [vmem:[#allocation0 + $0x40] ss:$8 sm:$0xf]  }
  0x13   :  { %v111_v26 = vsel %vm83_vm0, %v109_v22, %v107_v24  ;;  %v92_v27 = vsel %vm83_vm0, %v90_v23, %v88_v25 }
  0x14   :  { %146 = vst.msk [vmem:[%s227_s1 + $0x8] sm:$0xff] %vm85_vm1, %v92_v27   ;;  %112 = vrot.lane.b32.xlu0 %v111_v26, %s149_s0 }
  0x81   :  { %v103_v28 = vpop.permute.xlu0 %102  }
  0x82   :  { %105 = vst.msk [vmem:[%s227_s1] sm:$0xff] %vm104_vm2, %v103_v28  }
  0x86   :  { %v113_v29 = vpop.permute.xlu0 %112  }
  0x87   :  { %147 = vst.msk [vmem:[%s227_s1 + $0x8] sm:$0xff] %vm104_vm2, %v113_v29  }

// kernel: tile.19
= control target key start
LH: loop header
LB: loop body
LE: loop exit
PB: predicated region body
PF: predicated region fallthrough
CT: control target
= control target key end

     0   :  { %vm83_vm0 = vcmask 1047556   ;;  %vm85_vm1 = vcmask 130048   ;;  %s196_s9 = smov 48   ;;  %s197_s14 = smov 16   ;;  %vm104_vm2 = vcmask 523648   ;;  %vm125_vm3 = vcmask 392448   ;;  %s290_s0 = inlined_call_operand.vmem [shape: f32[16,4,16], index: 0, kind: input, shape index: {}]   ;;  %s291_s1 = inlined_call_operand.vmem [shape: f32[16,64], index: 1, kind: output, shape index: {}]  }
   0x1   :  { %v181_v0 = vld [vmem:[%s290_s0 + $0x1c] sm:$0xf]  ;;  %v182_v1 = vld [vmem:[%s290_s0 + $0x18] sm:$0xf]  ;;  %v183_v2 = vld [vmem:[%s290_s0 + $0x14] sm:$0xf] }
   0x2   :  { %49 = vst [vmem:[#allocation0 + $0x38] sm:$0xf] %v181_v0  ;;  %54 = vst [vmem:[#allocation0 + $0x30] sm:$0xf] %v182_v1  ;;  %v184_v3 = vld [vmem:[%s290_s0 + $0x10] sm:$0xf] }
   0x3   :  { %59 = vst [vmem:[#allocation0 + $0x28] sm:$0xf] %v183_v2  ;;  %v185_v4 = vld [vmem:[%s290_s0 + $0xc] sm:$0xf]  ;;  %v186_v5 = vld [vmem:[%s290_s0 + $0x8] sm:$0xf] }
   0x4   :  { %64 = vst [vmem:[#allocation0 + $0x20] sm:$0xf] %v184_v3  ;;  %69 = vst [vmem:[#allocation0 + $0x18] sm:$0xf] %v185_v4  ;;  %v187_v6 = vld [vmem:[%s290_s0 + $0x4] sm:$0xf] }
   0x5   :  { %74 = vst [vmem:[#allocation0 + $0x10] sm:$0xf] %v186_v5  ;;  %v79_v7 = vld [vmem:[%s290_s0] sm:$0xf]  ;;  %78 = vst [vmem:[#allocation0 + $0x8] sm:$0xf] %v187_v6 }
   0x6   :  { %80 = vst [vmem:[#allocation0] sm:$0xf] %v79_v7  ;;  %v173_v8 = vld [vmem:[%s290_s0 + $0x3c] sm:$0xf]  ;;  %v174_v9 = vld [vmem:[%s290_s0 + $0x38] sm:$0xf] }
   0x7   :  { %9 = vst [vmem:[#allocation0 + $0x78] sm:$0xf] %v173_v8  ;;  %14 = vst [vmem:[#allocation0 + $0x70] sm:$0xf] %v174_v9  ;;  %v175_v10 = vld [vmem:[%s290_s0 + $0x34] sm:$0xf] }
   0x8   :  { %v176_v11 = vld [vmem:[%s290_s0 + $0x30] sm:$0xf]  ;;  %v177_v12 = vld [vmem:[%s290_s0 + $0x2c] sm:$0xf]  ;;  %19 = vst [vmem:[#allocation0 + $0x68] sm:$0xf] %v175_v10 }
   0x9   :  { %24 = vst [vmem:[#allocation0 + $0x60] sm:$0xf] %v176_v11  ;;  %29 = vst [vmem:[#allocation0 + $0x58] sm:$0xf] %v177_v12  ;;  %v178_v13 = vld [vmem:[%s290_s0 + $0x28] sm:$0xf] }
   0xa   :  { %v179_v14 = vld [vmem:[%s290_s0 + $0x24] sm:$0xf]  ;;  %v180_v15 = vld [vmem:[%s290_s0 + $0x20] sm:$0xf]  ;;  %34 = vst [vmem:[#allocation0 + $0x50] sm:$0xf] %v178_v13 }
   0xb   :  { %39 = vst [vmem:[#allocation0 + $0x48] sm:$0xf] %v179_v14  ;;  %44 = vst [vmem:[#allocation0 + $0x40] sm:$0xf] %v180_v15  ;;  %s195_s0 = smov 32   ;;  %vm146_vm4 = vcmask 261248  }
   0xc   :  { %v120_v16 = vld [vmem:[#allocation0 + $0x2] ss:$8 sm:$0xf0]   ;;  %v99_v17 = vld [vmem:[#allocation0 + $0x3] ss:$8 sm:$0xf0]  }
   0xd   :  { %v118_v18 = vld [vmem:[#allocation0 + $0x2] ss:$8 sm:$0xf]   ;;  %v97_v19 = vld [vmem:[#allocation0 + $0x3] ss:$8 sm:$0xf]  }
   0xe   :  { %v122_v20 = vsel %vm83_vm0, %v120_v16, %v118_v18  ;;  %v101_v21 = vsel %vm83_vm0, %v99_v17, %v97_v19  ;;  %v139_v24 = vld [vmem:[#allocation0 + $0x1] ss:$8 sm:$0xf]   ;;  %v81_v32 = vld [vmem:[#allocation0] ss:$8 sm:$0xf]  }
   0xf   :  { %123 = vrot.lane.b32.xlu1 %v122_v20, %s195_s0  ;;  %102 = vrot.lane.b32.xlu0 %v101_v21, %s196_s9  ;;  %v141_v25 = vld [vmem:[#allocation0 + $0x1] ss:$8 sm:$0xf0]   ;;  %v82_v33 = vld [vmem:[#allocation0] ss:$8 sm:$0xf0]  }
  0x10   :  { %v130_v22 = vld [vmem:[#allocation0 + $0x42] ss:$8 sm:$0xf0]   ;;  %v109_v23 = vld [vmem:[#allocation0 + $0x43] ss:$8 sm:$0xf0]   ;;  %v84_v34 = vsel %vm83_vm0, %v82_v33, %v81_v32  ;;  %v143_v38 = vsel %vm83_vm0, %v141_v25, %v139_v24 }
  0x11   :  { %v151_v31 = vld [vmem:[#allocation0 + $0x41] ss:$8 sm:$0xf0]   ;;  %v90_v36 = vld [vmem:[#allocation0 + $0x40] ss:$8 sm:$0xf0]  }
  0x12   :  { %v128_v26 = vld [vmem:[#allocation0 + $0x42] ss:$8 sm:$0xf]   ;;  %v107_v27 = vld [vmem:[#allocation0 + $0x43] ss:$8 sm:$0xf]  }
  0x13   :  { %v132_v28 = vsel %vm83_vm0, %v130_v22, %v128_v26  ;;  %v111_v29 = vsel %vm83_vm0, %v109_v23, %v107_v27  ;;  %v149_v30 = vld [vmem:[#allocation0 + $0x41] ss:$8 sm:$0xf]   ;;  %v88_v35 = vld [vmem:[#allocation0 + $0x40] ss:$8 sm:$0xf]  }
  0x14   :  { %133 = vrot.lane.b32.xlu1 %v132_v28, %s195_s0  ;;  %112 = vrot.lane.b32.xlu0 %v111_v29, %s196_s9  ;;  %v153_v37 = vsel %vm83_vm0, %v151_v31, %v149_v30  ;;  %86 = vst.msk [vmem:[%s291_s1] sm:$0xff] %vm85_vm1, %v84_v34   ;;  %v92_v39 = vsel %vm83_vm0, %v90_v36, %v88_v35 }
  0x15   :  { %188 = vst.msk [vmem:[%s291_s1 + $0x8] sm:$0xff] %vm85_vm1, %v92_v39  }
  0x18   :  { %154 = vrot.lane.b32.xlu1 %v153_v37, %s197_s14  ;;  %144 = vrot.lane.b32.xlu0 %v143_v38, %s197_s14 }
  0x81   :  { %v124_v40 = vpop.permute.xlu1 %123   ;;  %v103_v41 = vpop.permute.xlu0 %102  }
  0x82   :  { %105 = vst.msk [vmem:[%s291_s1] sm:$0xff] %vm104_vm2, %v103_v41  }
  0x83   :  { %126 = vst.msk [vmem:[%s291_s1] sm:$0xff] %vm125_vm3, %v124_v40  }
  0x86   :  { %v134_v42 = vpop.permute.xlu1 %133   ;;  %v113_v43 = vpop.permute.xlu0 %112  }
  0x87   :  { %189 = vst.msk [vmem:[%s291_s1 + $0x8] sm:$0xff] %vm104_vm2, %v113_v43  }
  0x88   :  { %190 = vst.msk [vmem:[%s291_s1 + $0x8] sm:$0xff] %vm125_vm3, %v134_v42  }
  0x8a   :  { %v155_v44 = vpop.permute.xlu1 %154   ;;  %v145_v45 = vpop.permute.xlu0 %144  }
  0x8b   :  { %191 = vst.msk [vmem:[%s291_s1 + $0x8] sm:$0xff] %vm146_vm4, %v155_v44   ;;  %147 = vst.msk [vmem:[%s291_s1] sm:$0xff] %vm146_vm4, %v145_v45  }

// kernel: _granite_decoder_layer.1
= control target key start
LH: loop header
LB: loop body
LE: loop exit
PB: predicated region body
PF: predicated region fallthrough
CT: control target
= control target key end

     0   :  { %vm53_vm0 = vcmask 523264   ;;  %s2257_s0 = inlined_call_operand.vmem [shape: f32[16,64], index: 0, kind: input, shape index: {}]   ;;  %s2258_s1 = inlined_call_operand.vmem [shape: f32[16,64], index: 1, kind: input, shape index: {}]   ;;  %s2259_s2 = inlined_call_operand.vmem [shape: f32[16,64], index: 2, kind: input, shape index: {}]   ;;  %s2260_s3 = inlined_call_operand.vmem [shape: f32[16,32], index: 3, kind: input, shape index: {}]   ;;  %s2261_s4 = inlined_call_operand.vmem [shape: f32[16,32], index: 4, kind: input, shape index: {}]   ;;  %s2262_s5 = inlined_call_operand.vmem [shape: f32[16,16], index: 5, kind: input, shape index: {}]   ;;  %s2263_s6 = inlined_call_operand.vmem [shape: f32[64,128], index: 6, kind: input, shape index: {}]   ;;  %s2264_s7 = inlined_call_operand.vmem [shape: f32[64,64], index: 7, kind: input, shape index: {}]   ;;  %s2265_s8 = inlined_call_operand.vmem [shape: f32[64,256], index: 8, kind: input, shape index: {}]   ;;  %s2266_s9 = inlined_call_operand.vmem [shape: f32[128,64], index: 9, kind: input, shape index: {}]   ;;  %s2267_s10 = inlined_call_operand.vmem [shape: f32[1,64], index: 10, kind: input, shape index: {}]   ;;  %s2268_s11 = inlined_call_operand.vmem [shape: f32[1,64], index: 11, kind: input, shape index: {}]   ;;  %s2269_s12 = inlined_call_operand.vmem [shape: f32[64,64], index: 12, kind: input, shape index: {}]   ;;  %s2270_s13 = inlined_call_operand.vmem [shape: f32[32,32], index: 13, kind: input, shape index: {}]   ;;  %s2271_s14 = inlined_call_operand.hbm [shape: f32[16,64], index: 14, kind: output, shape index: {}]  }
   0x1   :  { %v1927_v0 = vld [vmem:[%s2257_s0] sm:$0xff]  ;;  %v1932_v1 = vld [vmem:[%s2257_s0 + $0x8] sm:$0xff] }
   0x2   :  { %19 = vsyncpa [#allocation3], 0  ;;  %v51_v2 = vmul.f32 %v1927_v0, %v1927_v0  ;;  %v52_v3 = vmul.f32 %v1932_v1, %v1932_v1  ;;  %v84_v6 = vld [vmem:[%s2263_s6 + $0x38] sm:$0xff]  ;;  %v83_v7 = vld [vmem:[%s2263_s6 + $0x30] sm:$0xff]  ;;  %s1839_s21 = smov 64   ;;  %vm285_vm1 = vcmask 261120  }
   0x3   :  { %1607 = vmatprep.subr.mxu0 %v84_v6  ;;  %v82_v8 = vld [vmem:[%s2263_s6 + $0x28] sm:$0xff]  ;;  %v81_v9 = vld [vmem:[%s2263_s6 + $0x20] sm:$0xff]  ;;  %v80_v10 = vld [vmem:[%s2263_s6 + $0x18] sm:$0xff]  ;;  %vm401_vm2 = vcmask 130048   ;;  %s1840_s16 = smov 112   ;;  %s1844_s25 = smov 16  }
   0x4   :  { %v54_v4 = vsel %vm53_vm0, %v51_v2, 0.0  ;;  %v57_v5 = vsel %vm53_vm0, %v52_v3, 0.0  ;;  %1608 = vmatpush3.msra.mxu0 %v84_v6  ;;  %v79_v11 = vld [vmem:[%s2263_s6 + $0x10] sm:$0xff]  ;;  %v78_v12 = vld [vmem:[%s2263_s6 + $0x8] sm:$0xff]  ;;  %v77_v13 = vld [vmem:[%s2263_s6] sm:$0xff] }
   0x5   :  { %55 = vadd.xlane.f32.xlu0 %v54_v4  ;;  %1609 = vmatprep.subr.mxu0 %v83_v7  ;;  %v266_v14 = vld [vmem:[%s2260_s3 + $0x8] sm:$0xff]  ;;  %v177_v15 = vld [vmem:[%s2269_s12 + $0x38] sm:$0xff]  ;;  %v176_v16 = vld [vmem:[%s2269_s12 + $0x30] sm:$0xff] }
   0x6   :  { %1610 = vmatpush3.msra.mxu0 %v83_v7  ;;  %1626 = vmatprep.subr.mxu1 %v177_v15  ;;  %v175_v17 = vld [vmem:[%s2269_s12 + $0x28] sm:$0xff]  ;;  %v174_v18 = vld [vmem:[%s2269_s12 + $0x20] sm:$0xff]  ;;  %v173_v19 = vld [vmem:[%s2269_s12 + $0x18] sm:$0xff] }
   0x7   :  { %1611 = vmatprep.subr.mxu0 %v82_v8  ;;  %1627 = vmatpush3.msra.mxu1 %v177_v15  ;;  %v172_v20 = vld [vmem:[%s2269_s12 + $0x10] sm:$0xff]  ;;  %v1483_v28 = vld [vmem:[%s2267_s10] ss:$0 sm:$0xff]  ;;  %v171_v34 = vld [vmem:[%s2269_s12 + $0x8] sm:$0xff]  ;;  %s1841_s10 = smov 48  }
   0x8   :  { %1612 = vmatpush3.msra.mxu0 %v82_v8  ;;  %1628 = vmatprep.subr.mxu1 %v176_v16  ;;  %v170_v35 = vld [vmem:[%s2269_s12] sm:$0xff]  ;;  %v280_v36 = vld [vmem:[%s2270_s13 + $0x18] sm:$0xff]  ;;  %v279_v37 = vld [vmem:[%s2270_s13 + $0x10] sm:$0xff] }
   0x9   :  { %58 = vadd.xlane.f32.xlu0 %v57_v5  ;;  %1613 = vmatprep.subr.mxu0 %v81_v9  ;;  %v278_v38 = vld [vmem:[%s2270_s13 + $0x8] sm:$0xff]  ;;  %v277_v39 = vld [vmem:[%s2270_s13] sm:$0xff] }
   0xa   :  { %1614 = vmatpush3.msra.mxu0 %v81_v9  ;;  %1629 = vmatpush3.msra.mxu1 %v176_v16  ;;  %v265_v42 = vld [vmem:[%s2260_s3] sm:$0xff]  ;;  %v167_v45 = vld [vmem:[%s2258_s1 + $0x8] sm:$0xff] }
   0xb   :  { %1615 = vmatprep.subr.mxu0 %v80_v10  ;;  %1630 = vmatprep.subr.mxu1 %v175_v17  ;;  %v260_v46 = vld [vmem:[%s2259_s2 + $0x8] sm:$0xff]  ;;  %v166_v48 = vld [vmem:[%s2258_s1] sm:$0xff] }
   0xc   :  { %1616 = vmatpush3.msra.mxu0 %v80_v10  ;;  %1631 = vmatpush3.msra.mxu1 %v175_v17  ;;  %v259_v49 = vld [vmem:[%s2259_s2] sm:$0xff]  ;;  %v366_v57 = vld [vmem:[%s2261_s4 + $0x8] sm:$0xff] }
   0xd   :  { %1617 = vmatprep.subr.mxu0 %v79_v11  ;;  %1632 = vmatprep.subr.mxu1 %v174_v18  ;;  %v365_v61 = vld [vmem:[%s2261_s4] sm:$0xff]  ;;  %s1842_s4 = smov 96  }
   0xe   :  { %1618 = vmatpush3.msra.mxu0 %v79_v11  ;;  %1633 = vmatpush3.msra.mxu1 %v174_v18 }
   0xf   :  { %1619 = vmatprep.subr.mxu0 %v78_v12  ;;  %1634 = vmatprep.subr.mxu1 %v173_v19 }
  0x10   :  { %1620 = vmatpush3.msra.mxu0 %v78_v12  ;;  %1635 = vmatpush3.msra.mxu1 %v173_v19  ;;  %v380_v19 = vld [vmem:[%s2262_s5 + $0x8] sm:$0xff] }
  0x11   :  { %1621 = vmatprep.subr.mxu0 %v77_v13  ;;  %1636 = vmatprep.subr.mxu1 %v172_v20 }
  0x12   :  { %1622 = vmatpush3.msra.mxu0 %v77_v13  ;;  %1637 = vmatpush3.msra.mxu1 %v172_v20 }
  0x13   :  { %1638 = vmatprep.subr.mxu1 %v171_v34  ;;  %1645 = vmatprep.subr.mxu0 %v280_v36 }
  0x14   :  { %1639 = vmatpush3.msra.mxu1 %v171_v34 }
  0x15   :  { %1640 = vmatprep.subr.mxu1 %v170_v35 }
  0x16   :  { %1641 = vmatpush3.msra.mxu1 %v170_v35 }
  0x1f   :  { %271 = vrot.lane.b32.xlu0 %v266_v14, %s1839_s21 }
  0x8e   :  { %v56_v21 = vpop.xlane.xlu0 %55 }
  0x8f   :  { %v61_v22 = vmul.f32 0.015625, %v56_v21  ;;  %v379_v21 = vld [vmem:[%s2262_s5] sm:$0xff]  ;;  %s1843_s5 = smov 32  }
  0x91   :  { %v63_v23 = vadd.f32 1e-06, %v61_v22 }
  0x92   :  { %v59_v24 = vpop.xlane.xlu0 %58 }
  0x93   :  { %1769 = vrsqrt.f32 %v63_v23  ;;  %v62_v25 = vmul.f32 0.015625, %v59_v24 }
  0x95   :  { %v64_v26 = vadd.f32 1e-06, %v62_v25 }
  0x96   :  { %v272_v63 = vpop.permute.xlu0 %271 }
  0x97   :  { %1771 = vrsqrt.f32 %v64_v26 }
  0xa0   :  { %v1770_v27 = vpop.eup %1769 }
  0xa1   :  { %v67_v29 = vmul.f32 %v1770_v27, %v1927_v0 }
  0xa3   :  { %v75_v30 = vmul.f32 %v1483_v28, %v67_v29 }
  0xa4   :  { %v1772_v31 = vpop.eup %1771 }
  0xa5   :  { %v68_v32 = vmul.f32 %v1772_v31, %v1932_v1  ;;  %1623 = vmatprep.mubr.msk.f32.mxu0 %vm53_vm0, %v75_v30 }
  0xa7   :  { %v76_v33 = vmul.f32 %v1483_v28, %v68_v32 }
  0xa9   :  { %1624 = vmatmul.mubr.msk.f32.vlgmr.msra.gmra.mxu0 %vm53_vm0, %v76_v33 }
  0xaa   :  { %1646 = vmatpush3.msra.mxu0 %v280_v36 }
  0xab   :  { %1647 = vmatprep.subr.mxu0 %v279_v37 }
  0xac   :  { %1648 = vmatpush3.msra.mxu0 %v279_v37 }
  0xad   :  { %1649 = vmatprep.subr.mxu0 %v278_v38 }
  0xae   :  { %1650 = vmatpush3.msra.mxu0 %v278_v38 }
  0xaf   :  { %1651 = vmatprep.subr.mxu0 %v277_v39 }
  0xb0   :  { %1652 = vmatpush3.msra.mxu0 %v277_v39 }
 0x169   :  { %v2011_v40 = vpop.f32.mrf.mxu0 }
 0x16a   :  { %v169_v50 = vmul.f32 %v2011_v40, %v167_v45  ;;  %v276_v3 = vmul.f32 %v2011_v40, %v272_v63 }
 0x16b   :  { %v2013_v41 = vpop.f32.mrf.mxu0 }
 0x16c   :  { %281 = vrot.lane.b32.xlu1 %v2013_v41, %s1839_s21  ;;  %1642 = vmatprep.mubr.msk.f32.mxu1 %vm53_vm0, %v2013_v41  ;;  %v168_v54 = vmul.f32 %v166_v48, %v2013_v41 }
 0x16d   :  { %1643 = vmatmul.mubr.msk.f32.vlgmr.msra.gmra.mxu1 %vm53_vm0, %v2011_v40 }
 0x170   :  { %283 = vrot.lane.b32.xlu1 %v2011_v40, %s1839_s21 }
 0x174   :  { %269 = vrot.lane.b32.xlu1 %v265_v42, %s1839_s21 }
 0x1de   :  { %v282_v43 = vpop.permute.xlu1 %281 }
 0x1df   :  { %1653 = vmatprep.mubr.msk.f32.mxu0 %vm285_vm1, %v282_v43 }
 0x1e2   :  { %v284_v44 = vpop.permute.xlu1 %283 }
 0x1e3   :  { %1654 = vmatmul.mubr.msk.f32.vlgmr.msra.gmra.mxu0 %vm285_vm1, %v284_v44 }
 0x1e6   :  { %v270_v2 = vpop.permute.xlu1 %269 }
 0x1e7   :  { %v275_v6 = vmul.f32 %v270_v2, %v2013_v41 }
 0x22d   :  { %v1644_v47 = vpop.f32.mrf.mxu1 }
 0x22e   :  { %v262_v51 = vmul.f32 %v1644_v47, %v260_v46 }
 0x22f   :  { %v250_v52 = vpop.f32.mrf.mxu1 }
 0x230   :  { %v264_v53 = vadd.f32 %v262_v51, %v169_v50  ;;  %v261_v55 = vmul.f32 %v259_v49, %v250_v52 }
 0x232   :  { %v263_v56 = vadd.f32 %v261_v55, %v168_v54  ;;  %393 = vrot.lane.b32.xlu0 %v264_v53, %s1840_s16 }
 0x234   :  { %1660 = vmatprep.mubr.msk.f32.mxu1 %vm401_vm2, %v263_v56 }
 0x2a3   :  { %v1655_v58 = vpop.f32.mrf.mxu0 }
 0x2a4   :  { %v368_v59 = vmul.f32 %v1655_v58, %v366_v57  ;;  %v394_v9 = vpop.permute.xlu0 %393 }
 0x2a5   :  { %v356_v60 = vpop.f32.mrf.mxu0 }
 0x2a6   :  { %373 = vrot.lane.b32.xlu1 %v368_v59, %s1839_s21  ;;  %v367_v62 = vmul.f32 %v365_v61, %v356_v60 }
 0x2aa   :  { %371 = vrot.lane.b32.xlu1 %v367_v62, %s1839_s21 }
 0x318   :  { %v374_v4 = vpop.permute.xlu1 %373 }
 0x319   :  { %v378_v5 = vadd.f32 %v374_v4, %v276_v3 }
 0x31b   :  { %399 = vrot.lane.b32.xlu1 %v378_v5, %s1839_s21 }
 0x31c   :  { %v372_v7 = vpop.permute.xlu1 %371 }
 0x31d   :  { %v377_v8 = vadd.f32 %v372_v7, %v275_v6 }
 0x31f   :  { %816 = vrot.lane.b32.xlu0 %v377_v8, %s1841_s10  ;;  %397 = vrot.lane.b32.xlu1 %v377_v8, %s1839_s21 }
 0x323   :  { %810 = vrot.lane.b32.xlu0 %v264_v53, %s1842_s4  ;;  %391 = vrot.lane.b32.xlu1 %v263_v56, %s1840_s16 }
 0x327   :  { %818 = vrot.lane.b32.xlu1 %v378_v5, %s1841_s10  ;;  %814 = vrot.lane.b32.xlu0 %v394_v9, %s1842_s4 }
 0x32b   :  { %808 = vrot.lane.b32.xlu1 %v263_v56, %s1842_s4 }
 0x38d   :  { %v400_v10 = vpop.permute.xlu1 %399 }
 0x38e   :  { %1656 = vmatprep.subr.msk.mxu1 %vm401_vm2, %v400_v10 }
 0x38f   :  { %1657 = vmatpush3.xpose.msk.msra.mxu1 %vm401_vm2, %v400_v10 }
 0x391   :  { %v398_v11 = vpop.permute.xlu1 %397  ;;  %v817_v14 = vpop.permute.xlu0 %816 }
 0x392   :  { %1658 = vmatprep.subr.msk.mxu1 %vm401_vm2, %v398_v11 }
 0x393   :  { %1659 = vmatpush3.xpose.msk.msra.mxu1 %vm401_vm2, %v398_v11 }
 0x395   :  { %v392_v12 = vpop.permute.xlu1 %391  ;;  %v811_v16 = vpop.permute.xlu0 %810 }
 0x396   :  { %1661 = vmatmul.mubr.msk.f32.vlgmr.msra.gmra.mxu1 %vm401_vm2, %v264_v53  ;;  %812 = vrot.lane.b32.xlu1 %v392_v12, %s1842_s4 }
 0x397   :  { %1663 = vmatprep.mubr.msk.f32.mxu1 %vm401_vm2, %v392_v12 }
 0x399   :  { %v819_v13 = vpop.permute.xlu1 %818  ;;  %v815_v18 = vpop.permute.xlu0 %814 }
 0x39a   :  { %1664 = vmatmul.mubr.msk.f32.gmra.mxu1 %vm401_vm2, %v394_v9  ;;  %1690 = vmatprep.subr.msk.mxu1 %vm401_vm2, %v819_v13 }
 0x39b   :  { %1691 = vmatpush3.xpose.msk.msra.mxu1 %vm401_vm2, %v819_v13 }
 0x39c   :  { %1692 = vmatprep.subr.msk.mxu1 %vm401_vm2, %v817_v14 }
 0x39d   :  { %v809_v15 = vpop.permute.xlu1 %808 }
 0x39e   :  { %1694 = vmatprep.mubr.msk.f32.mxu1 %vm401_vm2, %v809_v15 }
 0x39f   :  { %1693 = vmatpush3.xpose.msk.msra.mxu1 %vm401_vm2, %v817_v14 }
 0x3a2   :  { %1695 = vmatmul.mubr.msk.f32.vlgmr.msra.gmra.mxu1 %vm401_vm2, %v811_v16 }
 0x408   :  { %v813_v17 = vpop.permute.xlu1 %812 }
 0x409   :  { %1697 = vmatprep.mubr.msk.f32.mxu1 %vm401_vm2, %v813_v17 }
 0x40a   :  { %1698 = vmatmul.mubr.msk.f32.gmra.mxu1 %vm401_vm2, %v815_v18 }
 0x456   :  { %v1662_v20 = vpop.f32.mrf.mxu1 }
 0x457   :  { %v486_v22 = vadd.f32 %v1662_v20, %v380_v19 }
 0x458   :  { %v480_v23 = vpop.f32.mrf.mxu1 }
 0x459   :  { %v481_v24 = vadd.f32 %v480_v23, %v379_v21  ;;  %v502_v25 = vsel %vm401_vm2, %v486_v22, -inf }
 0x45a   :  { %v1665_v26 = vpop.f32.mrf.mxu1  ;;  %503 = vmax.xlane.f32.xlu0 %v502_v25 }
 0x45b   :  { %v496_v27 = vadd.f32 %v1665_v26, %v380_v19  ;;  %v499_v28 = vsel %vm401_vm2, %v481_v24, -inf }
 0x45c   :  { %500 = vmax.xlane.f32.xlu1 %v499_v28  ;;  %v490_v29 = vpop.f32.mrf.mxu1 }
 0x45d   :  { %v491_v30 = vadd.f32 %v490_v29, %v379_v21  ;;  %v508_v31 = vsel %vm401_vm2, %v496_v27, -inf }
 0x45f   :  { %v505_v32 = vsel %vm401_vm2, %v491_v30, -inf }
 0x460   :  { %509 = vmax.xlane.f32.xlu1 %v508_v31  ;;  %506 = vmax.xlane.f32.xlu0 %v505_v32 }
 0x462   :  { %v1696_v55 = vpop.f32.mrf.mxu1 }
 0x463   :  { %v904_v59 = vadd.f32 %v1696_v55, %v380_v19 }
 0x464   :  { %v898_v56 = vpop.f32.mrf.mxu1 }
 0x465   :  { %v899_v58 = vadd.f32 %v898_v56, %v379_v21  ;;  %v920_v2 = vsel %vm401_vm2, %v904_v59, -inf }
 0x467   :  { %v917_v62 = vsel %vm401_vm2, %v899_v58, -inf }
 0x4ca   :  { %v1699_v57 = vpop.f32.mrf.mxu1 }
 0x4cb   :  { %v914_v61 = vadd.f32 %v1699_v57, %v380_v19 }
 0x4cc   :  { %v908_v60 = vpop.f32.mrf.mxu1 }
 0x4cd   :  { %v909_v63 = vadd.f32 %v908_v60, %v379_v21  ;;  %v926_v3 = vsel %vm401_vm2, %v914_v61, -inf }
 0x4cf   :  { %v923_v4 = vsel %vm401_vm2, %v909_v63, -inf }
 0x4e3   :  { %v504_v33 = vpop.xlane.xlu0 %503 }
 0x4e4   :  { %v512_v34 = vsub.f32 %v486_v22, %v504_v33 }
 0x4e5   :  { %v501_v35 = vpop.xlane.xlu1 %500 }
 0x4e6   :  { %v517_v36 = vmul.f32 1.442695, %v512_v34  ;;  %v511_v37 = vsub.f32 %v481_v24, %v501_v35 }
 0x4e8   :  { %1773 = vpow2.f32 %v517_v36  ;;  %v515_v38 = vmul.f32 1.442695, %v511_v37 }
 0x4e9   :  { %v510_v39 = vpop.xlane.xlu1 %509  ;;  %v507_v42 = vpop.xlane.xlu0 %506 }
 0x4ea   :  { %1775 = vpow2.f32 %v515_v38  ;;  %v514_v43 = vsub.f32 %v496_v27, %v510_v39  ;;  %v513_v44 = vsub.f32 %v491_v30, %v507_v42  ;;  %v384_v39 = vld [vmem:[%s2264_s7 + $0x18] sm:$0xff]  ;;  %v383_v42 = vld [vmem:[%s2264_s7 + $0x10] sm:$0xff] }
 0x4ec   :  { %v521_v45 = vmul.f32 1.442695, %v514_v43  ;;  %v519_v46 = vmul.f32 1.442695, %v513_v44  ;;  %v382_v43 = vld [vmem:[%s2264_s7 + $0x8] sm:$0xff] }
 0x4ee   :  { %1777 = vpow2.f32 %v521_v45 }
 0x4ef   :  { %1779 = vpow2.f32 %v519_v46 }
 0x4f5   :  { %v1774_v47 = vpop.eup %1773 }
 0x4f6   :  { %v526_v48 = vsel %vm401_vm2, %v1774_v47, 0.0 }
 0x4f7   :  { %v1776_v49 = vpop.eup %1775  ;;  %527 = vadd.xlane.f32.xlu1 %v526_v48 }
 0x4f8   :  { %v523_v50 = vsel %vm401_vm2, %v1776_v49, 0.0 }
 0x4f9   :  { %524 = vadd.xlane.f32.xlu0 %v523_v50  ;;  %v381_v50 = vld [vmem:[%s2264_s7] sm:$0xff] }
 0x4fb   :  { %v1778_v51 = vpop.eup %1777 }
 0x4fc   :  { %v1780_v52 = vpop.eup %1779  ;;  %v532_v53 = vsel %vm401_vm2, %v1778_v51, 0.0 }
 0x4fd   :  { %533 = vadd.xlane.f32.xlu1 %v532_v53  ;;  %v529_v54 = vsel %vm401_vm2, %v1780_v52, 0.0 }
 0x4fe   :  { %530 = vadd.xlane.f32.xlu0 %v529_v54 }
 0x50e   :  { %543 = vrot.lane.b32.xlu1 %v2013_v41, %s1843_s5 }
 0x514   :  { %545 = vrot.lane.b32.xlu0 %v2011_v40, %s1843_s5 }
 0x532   :  { %918 = vmax.xlane.f32.xlu1 %v917_v62  ;;  %v388_v62 = vld [vmem:[%s2264_s7 + $0x38] sm:$0xff] }
 0x533   :  { %921 = vmax.xlane.f32.xlu0 %v920_v2  ;;  %1717 = vmatprep.subr.mxu1 %v388_v62  ;;  %v387_v2 = vld [vmem:[%s2264_s7 + $0x30] sm:$0xff] }
 0x534   :  { %1718 = vmatpush3.msra.mxu1 %v388_v62  ;;  %v1380_v62 = vld [vmem:[%s2266_s9 + $0x40] sm:$0xff] }
 0x535   :  { %1719 = vmatprep.subr.mxu1 %v387_v2 }
 0x536   :  { %927 = vmax.xlane.f32.xlu1 %v926_v3  ;;  %1720 = vmatpush3.msra.mxu1 %v387_v2  ;;  %v1378_v2 = vld [vmem:[%s2266_s9 + $0x30] sm:$0xff] }
 0x537   :  { %924 = vmax.xlane.f32.xlu0 %v923_v4 }
 0x580   :  { %v528_v5 = vpop.xlane.xlu1 %527 }
 0x581   :  { %1781 = vrcp.f32 %v528_v5 }
 0x582   :  { %v525_v6 = vpop.xlane.xlu0 %524 }
 0x583   :  { %1783 = vrcp.f32 %v525_v6 }
 0x586   :  { %v534_v7 = vpop.xlane.xlu1 %533 }
 0x587   :  { %1785 = vrcp.f32 %v534_v7  ;;  %v531_v8 = vpop.xlane.xlu0 %530 }
 0x588   :  { %1787 = vrcp.f32 %v531_v8 }
 0x58a   :  { %v544_v10 = vpop.permute.xlu1 %543 }
 0x58b   :  { %v546_v9 = vpop.permute.xlu0 %545 }
 0x58c   :  { %1666 = vmatprep.subr.mxu0 %v546_v9 }
 0x58d   :  { %1667 = vmatpush3.msra.mxu0 %v546_v9 }
 0x58e   :  { %1668 = vmatprep.subr.mxu0 %v544_v10  ;;  %v1782_v11 = vpop.eup %1781 }
 0x58f   :  { %1669 = vmatpush3.msra.mxu0 %v544_v10  ;;  %v538_v14 = vmul.f32 %v1782_v11, %v1774_v47 }
 0x590   :  { %v1784_v12 = vpop.eup %1783  ;;  %1676 = vmatprep.subr.mxu0 %v384_v39 }
 0x591   :  { %v536_v13 = vmul.f32 %v1784_v12, %v1776_v49 }
 0x593   :  { %1670 = vmatprep.mubr.msk.f32.mxu0 %vm401_vm2, %v536_v13 }
 0x594   :  { %v1786_v15 = vpop.eup %1785  ;;  %1671 = vmatmul.mubr.msk.f32.vlgmr.msra.gmra.mxu0 %vm401_vm2, %v538_v14 }
 0x595   :  { %v1788_v16 = vpop.eup %1787  ;;  %v542_v17 = vmul.f32 %v1786_v15, %v1778_v51  ;;  %1677 = vmatpush3.msra.mxu0 %v384_v39  ;;  %v1259_v39 = vld [vmem:[%s2265_s8 + $0x10] sm:$0xff] }
 0x596   :  { %v540_v18 = vmul.f32 %v1788_v16, %v1780_v52  ;;  %1678 = vmatprep.subr.mxu0 %v383_v42 }
 0x597   :  { %1679 = vmatpush3.msra.mxu0 %v383_v42  ;;  %v1258_v42 = vld [vmem:[%s2265_s8 + $0x8] sm:$0xff] }
 0x598   :  { %1673 = vmatprep.mubr.msk.f32.mxu0 %vm401_vm2, %v540_v18  ;;  %1683 = vmatprep.subr.mxu0 %v382_v43 }
 0x599   :  { %1674 = vmatmul.mubr.msk.f32.gmra.mxu0 %vm401_vm2, %v542_v17 }
 0x5bb   :  { %v919_v19 = vpop.xlane.xlu1 %918 }
 0x5bc   :  { %v929_v20 = vsub.f32 %v899_v58, %v919_v19  ;;  %v922_v21 = vpop.xlane.xlu0 %921 }
 0x5bd   :  { %v930_v22 = vsub.f32 %v904_v59, %v922_v21 }
 0x5be   :  { %v933_v23 = vmul.f32 1.442695, %v929_v20 }
 0x5bf   :  { %v935_v24 = vmul.f32 1.442695, %v930_v22  ;;  %v928_v25 = vpop.xlane.xlu1 %927 }
 0x5c0   :  { %1789 = vpow2.f32 %v933_v23  ;;  %v932_v26 = vsub.f32 %v914_v61, %v928_v25  ;;  %v925_v27 = vpop.xlane.xlu0 %924  ;;  %v386_v61 = vld [vmem:[%s2264_s7 + $0x28] sm:$0xff] }
 0x5c1   :  { %1791 = vpow2.f32 %v935_v24  ;;  %v931_v28 = vsub.f32 %v909_v63, %v925_v27  ;;  %v385_v63 = vld [vmem:[%s2264_s7 + $0x20] sm:$0xff]  ;;  %v1270_v27 = vld [vmem:[%s2265_s8 + $0x68] sm:$0xff] }
 0x5c2   :  { %v939_v29 = vmul.f32 1.442695, %v932_v26 }
 0x5c3   :  { %v937_v30 = vmul.f32 1.442695, %v931_v28  ;;  %v1269_v28 = vld [vmem:[%s2265_s8 + $0x60] sm:$0xff] }
 0x5c4   :  { %1793 = vpow2.f32 %v939_v29  ;;  %v1845_v29 = vmov 0.0  }
 0x5c5   :  { %1795 = vpow2.f32 %v937_v30  ;;  %v1268_v30 = vld [vmem:[%s2265_s8 + $0x58] sm:$0xff] }
 0x5cd   :  { %v1790_v31 = vpop.eup %1789 }
 0x5ce   :  { %v1792_v32 = vpop.eup %1791  ;;  %v941_v33 = vsel %vm401_vm2, %v1790_v31, 0.0 }
 0x5cf   :  { %942 = vadd.xlane.f32.xlu0 %v941_v33  ;;  %v944_v34 = vsel %vm401_vm2, %v1792_v32, 0.0  ;;  %v1265_v33 = vld [vmem:[%s2265_s8 + $0x40] sm:$0xff] }
 0x5d0   :  { %945 = vadd.xlane.f32.xlu1 %v944_v34  ;;  %v1264_v34 = vld [vmem:[%s2265_s8 + $0x38] sm:$0xff] }
 0x5d1   :  { %v1794_v35 = vpop.eup %1793 }
 0x5d2   :  { %v1796_v36 = vpop.eup %1795  ;;  %v950_v37 = vsel %vm401_vm2, %v1794_v35, 0.0 }
 0x5d3   :  { %v947_v38 = vsel %vm401_vm2, %v1796_v36, 0.0 }
 0x5d4   :  { %951 = vadd.xlane.f32.xlu1 %v950_v37  ;;  %948 = vadd.xlane.f32.xlu0 %v947_v38  ;;  %v1261_v37 = vld [vmem:[%s2265_s8 + $0x20] sm:$0xff]  ;;  %v1260_v38 = vld [vmem:[%s2265_s8 + $0x18] sm:$0xff] }
 0x5e5   :  { %961 = vrot.lane.b32.xlu1 %v2013_v41, %s1844_s25 }
 0x5ea   :  { %963 = vrot.lane.b32.xlu0 %v2011_v40, %s1844_s25 }
 0x654   :  { %v1672_v44 = vpop.f32.mrf.mxu0 }
 0x656   :  { %v627_v45 = vpop.f32.mrf.mxu0 }
 0x658   :  { %v943_v46 = vpop.xlane.xlu0 %942 }
 0x659   :  { %v1675_v47 = vpop.f32.mrf.mxu0  ;;  %v946_v48 = vpop.xlane.xlu1 %945  ;;  %1797 = vrcp.f32 %v943_v46 }
 0x65a   :  { %1799 = vrcp.f32 %v946_v48 }
 0x65b   :  { %v637_v49 = vpop.f32.mrf.mxu0 }
 0x65c   :  { %1680 = vmatprep.mubr.msk.f32.mxu0 %vm401_vm2, %v637_v49 }
 0x65d   :  { %1681 = vmatmul.mubr.msk.f32.vlgmr.msra.gmra.mxu0 %vm401_vm2, %v1675_v47  ;;  %v952_v51 = vpop.xlane.xlu1 %951  ;;  %v949_v41 = vpop.xlane.xlu0 %948 }
 0x65e   :  { %1801 = vrcp.f32 %v952_v51  ;;  %1684 = vmatpush3.msra.mxu0 %v382_v43  ;;  %1687 = vmatprep.mubr.msk.f32.mxu0 %vm401_vm2, %v627_v45  ;;  %v1257_v43 = vld [vmem:[%s2265_s8] sm:$0xff] }
 0x65f   :  { %1803 = vrcp.f32 %v949_v41  ;;  %1685 = vmatprep.subr.mxu0 %v381_v50 }
 0x660   :  { %1686 = vmatpush3.msra.mxu0 %v381_v50 }
 0x661   :  { %1688 = vmatmul.mubr.msk.f32.vlgmr.msra.gmra.mxu0 %vm401_vm2, %v1672_v44  ;;  %v964_v40 = vpop.permute.xlu0 %963  ;;  %v962_v52 = vpop.permute.xlu1 %961 }
 0x662   :  { %1700 = vmatprep.subr.mxu0 %v964_v40 }
 0x663   :  { %1701 = vmatpush3.msra.mxu0 %v964_v40  ;;  %v1518_v40 = vld [vmem:[%s2268_s11] ss:$0 sm:$0xff] }
 0x664   :  { %1702 = vmatprep.subr.mxu0 %v962_v52 }
 0x665   :  { %1703 = vmatpush3.msra.mxu0 %v962_v52 }
 0x666   :  { %v1798_v53 = vpop.eup %1797  ;;  %1710 = vmatprep.subr.mxu0 %v386_v61 }
 0x667   :  { %v1800_v54 = vpop.eup %1799  ;;  %v954_v55 = vmul.f32 %v1798_v53, %v1790_v31  ;;  %v1267_v31 = vld [vmem:[%s2265_s8 + $0x50] sm:$0xff] }
 0x668   :  { %v956_v56 = vmul.f32 %v1800_v54, %v1792_v32  ;;  %v1266_v32 = vld [vmem:[%s2265_s8 + $0x48] sm:$0xff] }
 0x669   :  { %1704 = vmatprep.mubr.msk.f32.mxu0 %vm401_vm2, %v954_v55  ;;  %v1387_v55 = vld [vmem:[%s2266_s9 + $0x78] sm:$0xff] }
 0x66a   :  { %1705 = vmatmul.mubr.msk.f32.vlgmr.msra.gmra.mxu0 %vm401_vm2, %v956_v56  ;;  %1724 = vmatprep.subr.mxu1 %v1387_v55  ;;  %v1386_v56 = vld [vmem:[%s2266_s9 + $0x70] sm:$0xff] }
 0x66b   :  { %v1802_v57 = vpop.eup %1801  ;;  %1711 = vmatpush3.msra.mxu0 %v386_v61  ;;  %v1381_v61 = vld [vmem:[%s2266_s9 + $0x48] sm:$0xff] }
 0x66c   :  { %v1804_v58 = vpop.eup %1803  ;;  %v960_v59 = vmul.f32 %v1802_v57, %v1794_v35  ;;  %1712 = vmatprep.subr.mxu0 %v385_v63  ;;  %v1263_v35 = vld [vmem:[%s2265_s8 + $0x30] sm:$0xff]  ;;  %v1385_v57 = vld [vmem:[%s2266_s9 + $0x68] sm:$0xff] }
 0x66d   :  { %v958_v60 = vmul.f32 %v1804_v58, %v1796_v36  ;;  %1713 = vmatpush3.msra.mxu0 %v385_v63  ;;  %v1262_v36 = vld [vmem:[%s2265_s8 + $0x28] sm:$0xff]  ;;  %v1384_v58 = vld [vmem:[%s2266_s9 + $0x60] sm:$0xff]  ;;  %v1379_v63 = vld [vmem:[%s2266_s9 + $0x38] sm:$0xff] }
 0x66f   :  { %1707 = vmatprep.mubr.msk.f32.mxu0 %vm401_vm2, %v958_v60  ;;  %v1382_v60 = vld [vmem:[%s2266_s9 + $0x50] sm:$0xff] }
 0x670   :  { %1708 = vmatmul.mubr.msk.f32.gmra.mxu0 %vm401_vm2, %v960_v59  ;;  %v1383_v59 = vld [vmem:[%s2266_s9 + $0x58] sm:$0xff] }
 0x71d   :  { %v1682_v3 = vpop.f32.mrf.mxu0 }
 0x71f   :  { %v718_v4 = vpop.f32.mrf.mxu0 }
 0x721   :  { %v1689_v5 = vpop.f32.mrf.mxu0 }
 0x722   :  { %v805_v6 = vadd.f32 %v1689_v5, %v1682_v3  ;;  %v1377_v3 = vld [vmem:[%s2266_s9 + $0x28] sm:$0xff]  ;;  %v1375_v5 = vld [vmem:[%s2266_s9 + $0x18] sm:$0xff] }
 0x723   :  { %v799_v7 = vpop.f32.mrf.mxu0 }
 0x724   :  { %v800_v8 = vadd.f32 %v799_v7, %v718_v4  ;;  %v1376_v4 = vld [vmem:[%s2266_s9 + $0x20] sm:$0xff]  ;;  %v1373_v7 = vld [vmem:[%s2266_s9 + $0x8] sm:$0xff] }
 0x72a   :  { %v1706_v9 = vpop.f32.mrf.mxu0 }
 0x72c   :  { %v1045_v10 = vpop.f32.mrf.mxu0 }
 0x72d   :  { %1714 = vmatprep.mubr.msk.f32.mxu0 %vm401_vm2, %v1045_v10 }
 0x72e   :  { %1715 = vmatmul.mubr.msk.f32.vlgmr.msra.gmra.mxu0 %vm401_vm2, %v1706_v9 }
 0x72f   :  { %1343 = vmatprep.mubr.f32.mxu0 %v1845_v29 }
 0x730   :  { %v1709_v11 = vpop.f32.mrf.mxu0 }
 0x732   :  { %v1055_v12 = vpop.f32.mrf.mxu0 }
 0x733   :  { %1721 = vmatprep.mubr.msk.f32.mxu1 %vm401_vm2, %v1055_v12 }
 0x734   :  { %1722 = vmatmul.mubr.msk.f32.vlgmr.msra.gmra.mxu1 %vm401_vm2, %v1709_v11 }
 0x735   :  { %1725 = vmatpush3.msra.mxu1 %v1387_v55 }
 0x736   :  { %1726 = vmatprep.subr.mxu1 %v1386_v56 }
 0x737   :  { %1727 = vmatpush3.msra.mxu1 %v1386_v56 }
 0x738   :  { %1728 = vmatprep.subr.mxu1 %v1385_v57 }
 0x739   :  { %1729 = vmatpush3.msra.mxu1 %v1385_v57 }
 0x73a   :  { %1730 = vmatprep.subr.mxu1 %v1384_v58 }
 0x73b   :  { %1731 = vmatpush3.msra.mxu1 %v1384_v58 }
 0x73c   :  { %1732 = vmatprep.subr.mxu1 %v1383_v59 }
 0x73d   :  { %1733 = vmatpush3.msra.mxu1 %v1383_v59 }
 0x73e   :  { %1734 = vmatprep.subr.mxu1 %v1382_v60 }
 0x73f   :  { %1735 = vmatpush3.msra.mxu1 %v1382_v60 }
 0x740   :  { %1736 = vmatprep.subr.mxu1 %v1381_v61 }
 0x741   :  { %1737 = vmatpush3.msra.mxu1 %v1381_v61 }
 0x742   :  { %1738 = vmatprep.subr.mxu1 %v1380_v62 }
 0x743   :  { %1739 = vmatpush3.msra.mxu1 %v1380_v62 }
 0x744   :  { %1740 = vmatprep.subr.mxu1 %v1379_v63 }
 0x745   :  { %1741 = vmatpush3.msra.mxu1 %v1379_v63 }
 0x746   :  { %1742 = vmatprep.subr.mxu1 %v1378_v2 }
 0x747   :  { %1743 = vmatpush3.msra.mxu1 %v1378_v2 }
 0x748   :  { %1744 = vmatprep.subr.mxu1 %v1377_v3 }
 0x749   :  { %1745 = vmatpush3.msra.mxu1 %v1377_v3 }
 0x74a   :  { %1746 = vmatprep.subr.mxu1 %v1376_v4 }
 0x74b   :  { %1747 = vmatpush3.msra.mxu1 %v1376_v4 }
 0x74c   :  { %1748 = vmatprep.subr.mxu1 %v1375_v5 }
 0x74d   :  { %1749 = vmatpush3.msra.mxu1 %v1375_v5 }
 0x7ee   :  { %v1716_v13 = vpop.f32.mrf.mxu0 }
 0x7ef   :  { %v1146_v15 = vadd.f32 %v1716_v13, %v805_v6  ;;  %v1374_v6 = vld [vmem:[%s2266_s9 + $0x10] sm:$0xff] }
 0x7f0   :  { %v1136_v14 = vpop.f32.mrf.mxu0  ;;  %1750 = vmatprep.subr.mxu1 %v1374_v6 }
 0x7f1   :  { %v1145_v17 = vadd.f32 %v1136_v14, %v800_v8  ;;  %1751 = vmatpush3.msra.mxu1 %v1374_v6  ;;  %v1372_v8 = vld [vmem:[%s2266_s9] sm:$0xff]  ;;  %s1846_s9 = smov [#allocation2]  }
 0x7f2   :  { %1752 = vmatprep.subr.mxu1 %v1373_v7  ;;  %s1472_s5 = sshll.u32 %s1846_s9, 4  ;;  %s1473_s5 = int_to_ptr.vmem [resolvable:$true] %s1472_s5 }
 0x7f3   :  { %1753 = vmatpush3.msra.mxu1 %v1373_v7  ;;  %s1817_s11 = scalar_lea.vmem %s1473_s5, 256  ;;  %p1822_p1 = scmp.lt.s32.totalorder %s1473_s5, %s1473_s5 }
 0x7f4   :  { %v1723_v16 = vpop.f32.mrf.mxu1  ;;  %1754 = vmatprep.subr.mxu1 %v1372_v8  ;;  %p1818_p0 = scmp.ne.s32.totalorder %s1473_s5, %s1817_s11  ;;  %p1823_p2 = scmp.lt.s32.totalorder %s1817_s11, %s1817_s11 }
 0x7f5   :  { %v1229_v18 = vadd.f32 %v1723_v16, %v1146_v15  ;;  %1755 = vmatpush3.msra.mxu1 %v1372_v8 }
 0x7f6   :  { %v1219_v19 = vpop.f32.mrf.mxu1  ;;  %p1824_p3 = por %p1823_p2, %p1822_p1 }
 0x7f7   :  { %v2136_v20 = vadd.f32 %v1229_v18, %v1932_v1  ;;  %v1228_v21 = vadd.f32 %v1219_v19, %v1145_v17  ;;  %v1272_v1 = vld [vmem:[%s2265_s8 + $0x78] sm:$0xff] }
 0x7f8   :  { %1295 = vmatprep.subr.mxu0 %v1272_v1  ;;  %p1825_p4 = pnand %p1824_p3, %p1818_p0 }
 0x7f9   :  { %v2139_v22 = vadd.f32 %v1228_v21, %v1927_v0  ;;  %v1234_v23 = vmul.f32 %v2136_v20, %v2136_v20  ;;  %v1271_v0 = vld [vmem:[%s2265_s8 + $0x70] sm:$0xff] }
 0x7fa   :  { %1296 = vmatpush1.msra.mxu0 %v1271_v0 }
 0x7fb   :  { %v1238_v24 = vsel %vm53_vm0, %v1234_v23, 0.0  ;;  %v1233_v25 = vmul.f32 %v2139_v22, %v2139_v22  ;;  %1297 = vmatprep.subr.mxu0 %v1270_v27 }
 0x7fc   :  { %1239 = vadd.xlane.f32.xlu0 %v1238_v24  ;;  %1298 = vmatpush1.msra.mxu0 %v1269_v28 }
 0x7fd   :  { %v1235_v26 = vsel %vm53_vm0, %v1233_v25, 0.0  ;;  %1299 = vmatprep.subr.mxu0 %v1268_v30 }
 0x7fe   :  { %1236 = vadd.xlane.f32.xlu1 %v1235_v26  ;;  %1300 = vmatpush1.msra.mxu0 %v1267_v31 }
 0x7ff   :  { %1301 = vmatprep.subr.mxu0 %v1266_v32 }
 0x800   :  { %1302 = vmatpush1.msra.mxu0 %v1265_v33 }
 0x801   :  { %1303 = vmatprep.subr.mxu0 %v1264_v34 }
 0x802   :  { %1304 = vmatpush1.msra.mxu0 %v1263_v35 }
 0x803   :  { %1305 = vmatprep.subr.mxu0 %v1262_v36 }
 0x804   :  { %1306 = vmatpush1.msra.mxu0 %v1261_v37 }
 0x805   :  { %1307 = vmatprep.subr.mxu0 %v1260_v38 }
 0x806   :  { %1308 = vmatpush1.msra.mxu0 %v1259_v39 }
 0x807   :  { %1309 = vmatprep.subr.mxu0 %v1258_v42 }
 0x808   :  { %1310 = vmatpush1.msra.mxu0 %v1257_v43 }
 0x885   :  { %v1240_v44 = vpop.xlane.xlu0 %1239 }
 0x886   :  { %v1242_v45 = vmul.f32 0.015625, %v1240_v44 }
 0x887   :  { %v1237_v46 = vpop.xlane.xlu1 %1236 }
 0x888   :  { %v1244_v47 = vadd.f32 1e-06, %v1242_v45  ;;  %v1241_v48 = vmul.f32 0.015625, %v1237_v46 }
 0x88a   :  { %v1243_v49 = vadd.f32 1e-06, %v1241_v48  ;;  %1805 = vrsqrt.f32 %v1244_v47 }
 0x88c   :  { %1807 = vrsqrt.f32 %v1243_v49 }
 0x897   :  { %v1806_v50 = vpop.eup %1805 }
 0x898   :  { %v1248_v53 = vmul.f32 %v1806_v50, %v2136_v20 }
 0x899   :  { %v1808_v51 = vpop.eup %1807 }
 0x89a   :  { %v1247_v41 = vmul.f32 %v1808_v51, %v2139_v22  ;;  %v1256_v54 = vmul.f32 %v1518_v40, %v1248_v53 }
 0x89c   :  { %v1255_v52 = vmul.f32 %v1518_v40, %v1247_v41 }
 0x89e   :  { %1519 = vmatmul.mubr.msk.f32.vlgmr.msra.gmra.mxu0 %vm53_vm0, %v1255_v52 }
 0x89f   :  { %1349 = vmatprep.mubr.f32.mxu0 %v1845_v29 }
 0x8a2   :  { %1520 = vmatmul.mubr.msk.f32.gmra.mxu0 %vm53_vm0, %v1256_v54 }
 0x95e   :  { %v1345_v9 = vpop.f32.mrf.mxu0 }
 0x95f   :  { %v1521_v10 = vmul.f32 -1.442695, %v1345_v9 }
 0x960   :  { %v1347_v11 = vpop.f32.mrf.mxu0 }
 0x961   :  { %1809 = vpow2.f32 %v1521_v10 }
 0x962   :  { %v1351_v12 = vpop.f32.mrf.mxu0 }
 0x963   :  { %v1522_v13 = vmul.f32 -1.442695, %v1351_v12 }
 0x964   :  { %v1353_v25 = vpop.f32.mrf.mxu0 }
 0x965   :  { %1811 = vpow2.f32 %v1522_v13 }
 0x96e   :  { %v1810_v14 = vpop.eup %1809 }
 0x96f   :  { %v1362_v15 = vadd.f32 1.0, %v1810_v14 }
 0x971   :  { %1813 = vrcp.f32 %v1362_v15 }
 0x972   :  { %v1812_v16 = vpop.eup %1811 }
 0x973   :  { %v1363_v17 = vadd.f32 1.0, %v1812_v16 }
 0x975   :  { %1815 = vrcp.f32 %v1363_v17 }
 0x97e   :  { %v1814_v18 = vpop.eup %1813 }
 0x97f   :  { %v1368_v19 = vmul.f32 %v1814_v18, %v1345_v9 }
 0x981   :  { %v1370_v21 = vmul.f32 %v1368_v19, %v1347_v11 }
 0x982   :  { %v1816_v23 = vpop.eup %1815 }
 0x983   :  { %v1369_v24 = vmul.f32 %v1816_v23, %v1351_v12  ;;  %1756 = vmatprep.mubr.f32.mxu1 %v1370_v21 }
 0x985   :  { %v1371_v26 = vmul.f32 %v1369_v24, %v1353_v25 }
 0x987   :  { %1757 = vmatmul.mubr.f32.vlgmr.msra.gmra.mxu1 %v1371_v26 }
 0xa47   :  { %v1758_v1 = vpop.f32.mrf.mxu1 }
 0xa48   :  { %v1464_v0 = vadd.f32 %v1758_v1, %v2136_v20 }
 0xa49   :  { %v1454_v27 = vpop.f32.mrf.mxu1 }
 0xa4a   :  { %1466 = vst.msk [vmem:[#allocation2 + $0x8] sm:$0xff] %vm53_vm0, %v1464_v0  ;;  %v1463_v28 = vadd.f32 %v1454_v27, %v2139_v22 }
 0xa4c   :  { %1465 = vst.msk [vmem:[#allocation2] sm:$0xff] %vm53_vm0, %v1463_v28 }
 0xa4d   :  { %1828 = shalt.err (!%p1825_p4)
}
 0xa4e   :  { %s1847_s6 = smov 128   ;;  %s1848_s22 = smov 8  }
 0xa4f   :  { %1478 = dma.vmem_to_hbm [thread:$0]  %s1473_s5, 256, %s2271_s14, [#allocation3], %s1847_s6, %s1847_s6, %s1848_s22  }
 0xa50   :  { %1837 = dma.done.wait [#allocation3], 256  }
 0xa51   :  { %1838 = vsyncadd [#allocation3], 4294967040 }
 0xa52   :  { %1482 = vsyncpa [#allocation3], 1 }

</bundles_post_ra>
